<compile_context>
chip_gen: v7x
topology: tpu7x:2x2x1
jax: 0.10.0
libtpu: 0.0.40
codegen_flags: <defaults>
</compile_context>

<pallas_src>
import functools

import jax
import jax.numpy as jnp
from jax.experimental import pallas as pl
from jax.experimental.pallas import tpu as pltpu


# --------------------------------------------------------------------------- #
# Kernel
# --------------------------------------------------------------------------- #
def _classifier_kernel(x_ref, sel_ref, wrep_ref, bias_ref, o_ref, acc_ref,
                       *, hw_total, hw_tile, masked):
    # x_ref:    (row_tile, hw_tile)  streaming input tile (rows = N*C rows)
    # sel_ref:  (n_tile, row_tile)   channel -> sample selection matrix (VMEM, 1 copy)
    # wrep_ref: (row_tile, K)        (scale/HW)*W tiled per-sample       (VMEM, 1 copy)
    # bias_ref: (1, K)               b + shift * W.sum(0)                (VMEM, 1 copy)
    # o_ref:    (n_tile, K)          output logits tile
    # acc_ref:  (row_tile, 1)        VMEM accumulator of per-row sums (always f32)
    hw_idx = pl.program_id(1)

    @pl.when(hw_idx == 0)
    def _init():
        acc_ref[...] = jnp.zeros_like(acc_ref)

    # Pure streaming reduction over the flattened spatial (lane) axis.
    # Accumulate in f32 even when x streams as bf16.
    x = x_ref[...].astype(jnp.float32)
    if masked:
        # Tail block may overhang the true H*W extent; zero the garbage lanes.
        col = jax.lax.broadcasted_iota(jnp.int32, x.shape, 1) + hw_idx * hw_tile
        x = jnp.where(col < hw_total, x, 0.0)
    acc_ref[...] += jnp.sum(x, axis=-1, keepdims=True)

    @pl.when(hw_idx == pl.num_programs(1) - 1)
    def _finalize():
        row_sums = acc_ref[...]                          # (row_tile, 1)
        contrib = row_sums * wrep_ref[...]               # (row_tile, K)
        logits = jnp.dot(sel_ref[...], contrib,
                         preferred_element_type=jnp.float32)
        o_ref[...] = (logits + bias_ref[...]).astype(o_ref.dtype)


# --------------------------------------------------------------------------- #
# Tiling heuristics
# --------------------------------------------------------------------------- #
def _pick_hw_tile(hw, itemsize, lane_cap_bytes=32 * 1024, pad_slack=0.03):
    """Lane-axis tile: a multiple of 128 (or the full hw), <= ~32 KiB per row."""
    cap = max(128, (lane_cap_bytes // itemsize) // 128 * 128)   # 8192 f32 / 16384 bf16
    if hw <= 128:
        return hw                                   # full dim (always legal)
    cands = list(range(128, min(cap, hw) + 1, 128))
    if hw <= cap:
        cands.append(hw)                            # full-dim candidate
    best_pad = min(pl.cdiv(hw, t) * t for t in cands)
    ok = [t for t in cands if pl.cdiv(hw, t) * t <= best_pad * (1.0 + pad_slack)]
    return max(ok)


def _pick_row_tile(rows, c, n, sublane_in, cap):
    """Largest sample-aligned, layout-legal row tile dividing rows; prefer >=2 tiles."""
    cands = []
    rt = c
    lim = min(cap, rows)
    while rt <= lim:
        if rows % rt == 0:
            nt = rt // c
            rows_ok = (rt % sublane_in == 0) or (rt == rows)   # x block sublane dim
            nt_ok = (nt % 8 == 0) or (nt == n)                 # f32 output block dim
            if rows_ok and nt_ok:
                cands.append(rt)
        rt += c
    if not cands:
        return rows                     # full-rows block (equals full dim -> legal)
    multi = [t for t in cands if rows // t >= 2]   # keep both v7x TCs busy if possible
    return max(multi) if multi else max(cands)


def _vmem_cap_bytes():
    """Generation-aware VMEM ceiling: ~3/4 of physical (48 MiB v7x, 96 MiB v5e/v6e)."""
    try:
        info = pltpu.get_tpu_info()
        phys = getattr(info, "vmem_capacity_bytes", None)
        if phys:
            return int(phys) * 3 // 4
    except Exception:
        pass
    return 48 << 20   # safe on every generation


# --------------------------------------------------------------------------- #
# Wrapper
# --------------------------------------------------------------------------- #
def classifier_wrapper_forward(x_nchw, w, b, *, scale=1.0, shift=0.0,
                               row_tile=None, hw_tile=None):
    """x_nchw: [N, C, H, W] f32/bf16; w: [C, K]; b: [K]. Returns logits [N, K] f32."""
    n, c, h, w_sp = x_nchw.shape
    k = w.shape[1]
    hw = h * w_sp
    rows = n * c

    # Lane/sublane-dense 2D view of the big streamed tensor (free reshape).
    x2d = x_nchw.reshape(rows, hw)
    if x2d.dtype not in (jnp.dtype(jnp.float32), jnp.dtype(jnp.bfloat16),
                         jnp.dtype(jnp.float16)):
        x2d = x2d.astype(jnp.float32)
    itemsize = jnp.dtype(x2d.dtype).itemsize
    sublane_in = 32 // itemsize          # 8 (f32) / 16 (bf16,f16)

    if hw_tile is None:
        hw_tile = _pick_hw_tile(hw, itemsize)
    grid_hw = pl.cdiv(hw, hw_tile)
    masked = (hw % hw_tile) != 0

    if row_tile is None:
        target_block_bytes = 8 << 20                       # ~8 MiB streamed tile
        row_cap = max(sublane_in, target_block_bytes // (hw_tile * itemsize))
        row_cap = max(c, min(row_cap, 512))
        row_tile = _pick_row_tile(rows, c, n, sublane_in, row_cap)
    n_tile = row_tile // c
    grid_rows = rows // row_tile

    # Fold scale/shift + 1/HW into the (tiny) head parameters:
    #   mean(scale*x+shift) @ W + b == (scale/HW)*sum(x) @ W + shift*W.sum(0) + b
    w32 = w.astype(jnp.float32)
    b32 = b.astype(jnp.float32)
    w_eff = w32 * (scale / hw)                                       # (C, K)
    bias_eff = (b32 + shift * jnp.sum(w32, axis=0)).reshape(1, k)    # (1, K)
    w_rep = jnp.tile(w_eff, (n_tile, 1))                             # (row_tile, K)
    sel = jnp.repeat(jnp.eye(n_tile, dtype=jnp.float32), c, axis=1)  # (n_tile, row_tile)

    grid = (grid_rows, grid_hw)

    # VMEM budget: double-buffered x tile + single-copy constants + out + scratch.
    x_block_bytes = row_tile * hw_tile * itemsize
    const_bytes = 4 * (sel.size + w_rep.size + bias_eff.size)
    out_bytes = 2 * n_tile * max(k, 128) * 4
    scratch_bytes = row_tile * 128 * 4
    need = 2 * x_block_bytes + const_bytes + out_bytes + scratch_bytes + (2 << 20)
    vmem_limit = int(min(max(need, 16 << 20), _vmem_cap_bytes()))

    cost = pl.CostEstimate(
        flops=(rows * hw                                  # streaming sum
               + rows * k                                 # row_sums * w_rep
               + 2 * grid_rows * n_tile * row_tile * k    # sel matmul (finalize)
               + n * k),                                  # bias add
        transcendentals=0,
        bytes_accessed=itemsize * x2d.size
        + 4 * (sel.size + w_rep.size + bias_eff.size + n * k),
    )

    kernel = functools.partial(_classifier_kernel,
                               hw_total=hw, hw_tile=hw_tile, masked=masked)

    return pl.pallas_call(
        kernel,
        out_shape=jax.ShapeDtypeStruct((n, k), jnp.float32),
        grid_spec=pltpu.PrefetchScalarGridSpec(
            num_scalar_prefetch=0,
            grid=grid,
            in_specs=[
                pl.BlockSpec((row_tile, hw_tile), lambda i, j: (i, j)),
                # Constants: single resident VMEM copy, no double-buffering.
                pl.BlockSpec(memory_space=pltpu.MemorySpace.VMEM),
                pl.BlockSpec(memory_space=pltpu.MemorySpace.VMEM),
                pl.BlockSpec(memory_space=pltpu.MemorySpace.VMEM),
            ],
            out_specs=pl.BlockSpec((n_tile, k), lambda i, j: (i, 0)),
            scratch_shapes=[pltpu.VMEM((row_tile, 1), jnp.float32)],
        ),
        compiler_params=pltpu.CompilerParams(
            dimension_semantics=("parallel", "arbitrary"),
            vmem_limit_bytes=vmem_limit,
        ),
        cost_estimate=cost,
    )(x2d, sel, w_rep, bias_eff)


def reference_forward(x_nchw, w, b, *, scale=1.0, shift=0.0):
    y = scale * x_nchw + shift
    pooled = jnp.mean(y, axis=(2, 3))
    return pooled @ w + b[None, :]


# --------------------------------------------------------------------------- #
# Demo / correctness checks
# --------------------------------------------------------------------------- #
if __name__ == "__main__":
    key = jax.random.PRNGKey(0)
    kx, kw, kb, kx2 = jax.random.split(key, 4)

    N, C, H, W = 2, 4, 16, 16
    NUM_CLASSES = 8
    SCALE, SHIFT = 2.0, -0.5

    x = jax.random.normal(kx, (N, C, H, W), dtype=jnp.float32)
    w = jax.random.normal(kw, (C, NUM_CLASSES), dtype=jnp.float32) * 0.1
    b = jax.random.normal(kb, (NUM_CLASSES,), dtype=jnp.float32) * 0.1

    ref = reference_forward(x, w, b, scale=SCALE, shift=SHIFT)

    # 1) Default (auto-picked) tiling: single spatial step at this toy size.
    out = classifier_wrapper_forward(x, w, b, scale=SCALE, shift=SHIFT)
    out = jax.block_until_ready(out)
    assert out.shape == (N, NUM_CLASSES)
    assert jnp.allclose(out, ref, atol=1e-4, rtol=1e-4), (out, ref)

    # 2) Forced multi-step spatial reduction: exercises the pipelined
    #    accumulator (init / accumulate / finalize) path.
    out2 = classifier_wrapper_forward(x, w, b, scale=SCALE, shift=SHIFT,
                                      hw_tile=128)
    out2 = jax.block_until_ready(out2)
    assert jnp.allclose(out2, ref, atol=1e-4, rtol=1e-4), (out2, ref)

    # 3) Non-128-divisible spatial size: cdiv grid + masked tail block
    #    (no host-side padded copy of x).
    H3, W3 = 12, 12
    x3 = jax.random.normal(kx2, (N, C, H3, W3), dtype=jnp.float32)
    ref3 = reference_forward(x3, w, b, scale=SCALE, shift=SHIFT)
    out3 = classifier_wrapper_forward(x3, w, b, scale=SCALE, shift=SHIFT,
                                      hw_tile=128)
    out3 = jax.block_until_ready(out3)
    assert jnp.allclose(out3, ref3, atol=1e-4, rtol=1e-4), (out3, ref3)

    # 4) bf16 streaming path: halves HBM bytes of the bandwidth-bound loop,
    #    f32 accumulation preserves accuracy.
    xb = x.astype(jnp.bfloat16)
    refb = reference_forward(xb.astype(jnp.float32), w, b, scale=SCALE, shift=SHIFT)
    outb = classifier_wrapper_forward(xb, w, b, scale=SCALE, shift=SHIFT)
    outb = jax.block_until_ready(outb)
    assert jnp.allclose(outb, refb, atol=2e-3, rtol=2e-3), (outb, refb)

    print("KERNEL_OK")
</pallas_src>

<mosaic_0001>
module attributes {stable_mosaic.version = 11 : i64} {
  func.func @_classifier_kernel(%arg0: i32, %arg1: i32, %arg2: memref<8x256xf32, #tpu.memory_space<vmem>>, %arg3: memref<2x8xf32, #tpu.memory_space<vmem>>, %arg4: memref<8x8xf32, #tpu.memory_space<vmem>>, %arg5: memref<1x8xf32, #tpu.memory_space<vmem>>, %arg6: memref<2x8xf32, #tpu.memory_space<vmem>>, %arg7: memref<8x1xf32, #tpu.memory_space<vmem>>) attributes {dimension_semantics = [#tpu.dimension_semantics<parallel>, #tpu.dimension_semantics<arbitrary>], iteration_bounds = array<i64: 1, 1>, scalar_prefetch = 0 : i64, scratch_operands = 1 : i64, tpu.core_type = #tpu.core_type<tc>, window_params = [{transform_indices = @transform_0, window_bounds = array<i64: 8, 256>}, {pipeline_mode = #tpu.pipeline_mode<synchronous>, transform_indices = @transform_1, window_bounds = array<i64: 2, 8>}, {pipeline_mode = #tpu.pipeline_mode<synchronous>, transform_indices = @transform_2, window_bounds = array<i64: 8, 8>}, {pipeline_mode = #tpu.pipeline_mode<synchronous>, transform_indices = @transform_3, window_bounds = array<i64: 1, 8>}, {transform_indices = @transform_4, window_bounds = array<i64: 2, 8>}]} {
    %c0_i32 = arith.constant 0 : i32
    %0 = arith.cmpi eq, %arg1, %c0_i32 : i32
    %1 = arith.extui %0 : i1 to i32
    %c0_i32_0 = arith.constant 0 : i32
    %2 = arith.cmpi ne, %1, %c0_i32_0 : i32
    scf.if %2 {
      %cst_8 = arith.constant 0.000000e+00 : f32
      %12 = vector.broadcast %cst_8 : f32 to vector<8x1xf32>
      %c0_9 = arith.constant 0 : index
      %c0_10 = arith.constant 0 : index
      %13 = vector.load %arg7[%c0_9, %c0_10] : memref<8x1xf32, #tpu.memory_space<vmem>>, vector<8x1xf32>
      tpu.vector_store %arg7[%c0_9, %c0_10], %12 {strides = array<i32>} : memref<8x1xf32, #tpu.memory_space<vmem>>, vector<8x1xf32>,
    } else {
    }
    %c0 = arith.constant 0 : index
    %c0_1 = arith.constant 0 : index
    %3 = vector.load %arg2[%c0, %c0_1] : memref<8x256xf32, #tpu.memory_space<vmem>>, vector<8x256xf32>
    %c0_2 = arith.constant 0 : index
    %c0_3 = arith.constant 0 : index
    %4 = vector.load %arg7[%c0_2, %c0_3] : memref<8x1xf32, #tpu.memory_space<vmem>>, vector<8x1xf32>
    %cst = arith.constant dense<0.000000e+00> : vector<8xf32>
    %5 = vector.multi_reduction <add>, %3, %cst [1] : vector<8x256xf32> to vector<8xf32>
    %6 = vector.shape_cast %5 : vector<8xf32> to vector<8x1xf32>
    %7 = arith.addf %4, %6 : vector<8x1xf32>
    %c0_4 = arith.constant 0 : index
    %c0_5 = arith.constant 0 : index
    %8 = vector.load %arg7[%c0_4, %c0_5] : memref<8x1xf32, #tpu.memory_space<vmem>>, vector<8x1xf32>
    tpu.vector_store %arg7[%c0_4, %c0_5], %7 {strides = array<i32>} : memref<8x1xf32, #tpu.memory_space<vmem>>, vector<8x1xf32>,
    %c0_i32_6 = arith.constant 0 : i32
    %9 = arith.cmpi eq, %arg1, %c0_i32_6 : i32
    %10 = arith.extui %9 : i1 to i32
    %c0_i32_7 = arith.constant 0 : i32
    %11 = arith.cmpi ne, %10, %c0_i32_7 : i32
    scf.if %11 {
      %c0_8 = arith.constant 0 : index
      %c0_9 = arith.constant 0 : index
      %12 = vector.load %arg7[%c0_8, %c0_9] : memref<8x1xf32, #tpu.memory_space<vmem>>, vector<8x1xf32>
      %c0_10 = arith.constant 0 : index
      %c0_11 = arith.constant 0 : index
      %13 = vector.load %arg4[%c0_10, %c0_11] : memref<8x8xf32, #tpu.memory_space<vmem>>, vector<8x8xf32>
      %14 = vector.broadcast %12 : vector<8x1xf32> to vector<8x8xf32>
      %15 = arith.mulf %14, %13 : vector<8x8xf32>
      %c0_12 = arith.constant 0 : index
      %c0_13 = arith.constant 0 : index
      %16 = vector.load %arg3[%c0_12, %c0_13] : memref<2x8xf32, #tpu.memory_space<vmem>>, vector<2x8xf32>
      %cst_14 = arith.constant dense<0.000000e+00> : vector<2x8xf32>
      %17 = tpu.matmul %16, %15, %cst_14 {dimension_numbers = #tpu.dot_dimension_numbers<[1], [0], [0], [1], [0, 0, 1, 1], [], []>} : vector<2x8xf32>, vector<8x8xf32>, vector<2x8xf32> -> vector<2x8xf32>
      %c0_15 = arith.constant 0 : index
      %c0_16 = arith.constant 0 : index
      %18 = vector.load %arg5[%c0_15, %c0_16] : memref<1x8xf32, #tpu.memory_space<vmem>>, vector<1x8xf32>
      %19 = vector.broadcast %18 : vector<1x8xf32> to vector<2x8xf32>
      %20 = arith.addf %17, %19 : vector<2x8xf32>
      %c0_17 = arith.constant 0 : index
      %c0_18 = arith.constant 0 : index
      %21 = vector.load %arg6[%c0_17, %c0_18] : memref<2x8xf32, #tpu.memory_space<vmem>>, vector<2x8xf32>
      tpu.vector_store %arg6[%c0_17, %c0_18], %20 {strides = array<i32>} : memref<2x8xf32, #tpu.memory_space<vmem>>, vector<2x8xf32>,
    } else {
    }
    return
  }
  func.func @transform_0(%arg0: i32, %arg1: i32) -> (i32, i32) {
    %c0_i32 = arith.constant 0 : i32
    return %arg0, %arg1 : i32, i32
  }
  func.func @transform_1(%arg0: i32, %arg1: i32) -> (i32, i32) {
    %c0_i32 = arith.constant 0 : i32
    %c0_i32_0 = arith.constant 0 : i32
    %c0_i32_1 = arith.constant 0 : i32
    return %c0_i32, %c0_i32_0 : i32, i32
  }
  func.func @transform_2(%arg0: i32, %arg1: i32) -> (i32, i32) {
    %c0_i32 = arith.constant 0 : i32
    %c0_i32_0 = arith.constant 0 : i32
    %c0_i32_1 = arith.constant 0 : i32
    return %c0_i32, %c0_i32_0 : i32, i32
  }
  func.func @transform_3(%arg0: i32, %arg1: i32) -> (i32, i32) {
    %c0_i32 = arith.constant 0 : i32
    %c0_i32_0 = arith.constant 0 : i32
    %c0_i32_1 = arith.constant 0 : i32
    return %c0_i32, %c0_i32_0 : i32, i32
  }
  func.func @transform_4(%arg0: i32, %arg1: i32) -> (i32, i32) {
    %c0_i32 = arith.constant 0 : i32
    %c0_i32_0 = arith.constant 0 : i32
    return %arg0, %c0_i32 : i32, i32
  }
}

</mosaic_0001>

<bundles_post_ra>
// kernel: tpu_custom_call.1
= control target key start
LH: loop header
LB: loop body
LE: loop exit
PB: predicated region body
PF: predicated region fallthrough
CT: control target
= control target key end

     0   :  { %9 = vsyncpa [#allocation4], 0  ;;  %s329_s0 = inlined_call_operand.hbm [shape: f32[8,256], index: 0, kind: input, shape index: {}]   ;;  %s330_s1 = inlined_call_operand.vmem [shape: f32[2,8], index: 1, kind: input, shape index: {}]   ;;  %s331_s2 = inlined_call_operand.hbm [shape: f32[8,8], index: 2, kind: input, shape index: {}]   ;;  %s332_s3 = inlined_call_operand.vmem [shape: f32[1,8], index: 3, kind: input, shape index: {}]   ;;  %s333_s4 = inlined_call_operand.hbm [shape: f32[2,8], index: 4, kind: output, shape index: {}]  }
   0x1   :  { %10 = vsyncpa [#allocation7], 0 }
   0x2   :  { %11 = vsyncpa [#allocation5], 0  ;;  %s256_s15 = smov [#allocation3]   ;;  %s257_s17 = smov [#allocation6]  }
   0x3   :  { %s18_s16 = sshll.u32 %s256_s15, 4  ;;  %s30_s18 = sshll.u32 %s257_s17, 4  ;;  %s19_s16 = int_to_ptr.vmem [resolvable:$true] %s18_s16  ;;  %s31_s18 = int_to_ptr.vmem [resolvable:$true] %s30_s18 }
   0x4   :  { %s184_s21 = scalar_lea.hbm %s329_s0, 256 }
   0x5   :  { %p185_p0 = scmp.ne.s32.totalorder %s329_s0, %s184_s21  ;;  %p188_p1 = scmp.lt.u32.totalorder %s184_s21, %s329_s0 }
   0x7   :  { %p190_p2 = pnand %p188_p1, %p185_p0 }
   0x9   :  { %193 = shalt.err (!%p190_p2)
}
   0xa   :  { %s194_s26 = scalar_lea.vmem %s19_s16, 256  ;;  %p199_p4 = scmp.lt.s32.totalorder %s19_s16, %s19_s16 }
   0xb   :  { %p195_p3 = scmp.ne.s32.totalorder %s19_s16, %s194_s26  ;;  %p200_p5 = scmp.lt.s32.totalorder %s194_s26, %s194_s26 }
   0xd   :  { %p201_p6 = por %p200_p5, %p199_p4 }
   0xf   :  { %p202_p7 = pnand %p201_p6, %p195_p3 }
  0x11   :  { %205 = shalt.err (!%p202_p7)
}
  0x12   :  { %21 = dma.hbm_to_vmem [thread:$0]  %s329_s0, 256, %s19_s16, [#allocation4]  }
  0x13   :  { %s206_s5 = scalar_lea.hbm %s331_s2, 128 }
  0x14   :  { %p207_p8 = scmp.ne.s32.totalorder %s331_s2, %s206_s5  ;;  %p210_p9 = scmp.lt.u32.totalorder %s206_s5, %s331_s2 }
  0x16   :  { %p212_p10 = pnand %p210_p9, %p207_p8 }
  0x18   :  { %215 = shalt.err (!%p212_p10)
}
  0x19   :  { %s216_s10 = scalar_lea.vmem %s31_s18, 128  ;;  %p221_p12 = scmp.lt.s32.totalorder %s31_s18, %s31_s18 }
  0x1a   :  { %p217_p11 = scmp.ne.s32.totalorder %s31_s18, %s216_s10  ;;  %p222_p13 = scmp.lt.s32.totalorder %s216_s10, %s216_s10 }
  0x1c   :  { %p223_p0 = por %p222_p13, %p221_p12 }
  0x1e   :  { %p224_p1 = pnand %p223_p0, %p217_p11 }
  0x20   :  { %227 = shalt.err (!%p224_p1)
}
  0x21   :  { %33 = dma.hbm_to_vmem [thread:$0]  %s331_s2, 128, %s31_s18, [#allocation7]  }
  0x22   :  { %250 = dma.done.wait [#allocation4], 256  }
  0x23   :  { %251 = vsyncadd [#allocation4], 4294967040 }
  0x24   :  { %252 = dma.done.wait [#allocation7], 128  }
  0x25   :  { %253 = vsyncadd [#allocation7], 4294967168  ;;  %vm46_vm0 = vcmask 7168   ;;  %v258_v0 = vmov 0.0   ;;  %v48_v1 = vld [vmem:[#allocation3] sm:$0xff]  ;;  %v49_v2 = vld [vmem:[#allocation3 + $0x8] sm:$0xff] }
  0x26   :  { %47 = vst.msk [vmem:[#allocation2] sm:$0xff] %vm46_vm0, %v258_v0  ;;  %172 = vmatprep.subr.mxu0 %v258_v0  ;;  %v51_v3 = vadd.f32 %v49_v2, %v48_v1  ;;  %v259_v4 = vmov 0   ;;  %vm260_vm1 = vmmov 0   ;;  %v61_v9 = vld [vmem:[#allocation6] sm:$0xff]  ;;  %v68_v12 = vld [vmem:[%s330_s1] sm:$0x3] }
  0x27   :  { %183 = vset.pattern.permute.xlu0 %v259_v4  ;;  %174 = vmatprep.mubr.msk.f32.mxu0 %vm260_vm1, %v258_v0  ;;  %vm76_vm2 = vcmask 64512   ;;  %v168_v13 = vld [vmem:[%s332_s3] ss:$0 sm:$0xff]  ;;  %s261_s15 = smov [#allocation8]   ;;  %vm150_vm3 = vcmask 58368  }
  0x28   :  { %52 = vadd.xlane.f32.xlu0 %v51_v3  ;;  %s158_s16 = sshll.u32 %s261_s15, 4  ;;  %s159_s16 = int_to_ptr.vmem [resolvable:$true] %s158_s16 }
  0x29   :  { %s228_s17 = scalar_lea.vmem %s159_s16, 32  ;;  %p233_p3 = scmp.lt.s32.totalorder %s159_s16, %s159_s16 }
  0x2a   :  { %p229_p2 = scmp.ne.s32.totalorder %s159_s16, %s228_s17  ;;  %p234_p4 = scmp.lt.s32.totalorder %s228_s17, %s228_s17 }
  0x2c   :  { %p235_p5 = por %p234_p4, %p233_p3 }
  0x2d   :  { %v50_v5 = vld [vmem:[#allocation2] sm:$0xff] }
  0x2e   :  { %p236_p6 = pnand %p235_p5, %p229_p2 }
  0xb5   :  { %v53_v6 = vpop.xlane.xlu0 %52 }
  0xb6   :  { %v54_v7 = vadd.f32 %v53_v6, %v50_v5 }
  0xb8   :  { %56 = vst.msk [vmem:[#allocation2] sm:$0xff] %vm46_vm0, %v54_v7 }
  0xbf   :  { %v60_v8 = vld [vmem:[#allocation2] sm:$0xff] }
  0xc0   :  { %64 = vperm.xlu0 %183, %v60_v8  }
 0x13f   :  { %v65_v10 = vpop.permute.xlu0 %64 }
 0x140   :  { %v67_v11 = vmul.f32 %v65_v10, %v61_v9 }
 0x142   :  { %173 = vmatpush3.msra.mxu0 %v67_v11 }
 0x143   :  { %175 = vmatmul.mubr.msk.f32.vlgmr.msra.gmra.mrb[0].mxu0 %vm76_vm2, %v68_v12 }
 0x216   :  { %v146_v14 = vpop.f32.mrb[0].mxu0 }
 0x217   :  { %v147_v15 = vadd.f32 %v168_v13, %v146_v14  ;;  %v176_v16 = vpop.f32.mrb[1].mxu0 }
 0x219   :  { %151 = vst.msk [vmem:[#allocation8] sm:$0x3] %vm150_vm3, %v147_v15 }
 0x21a   :  { %239 = shalt.err (!%p236_p6)
}
 0x21b   :  { %s240_s19 = scalar_lea.hbm %s333_s4, 32 }
 0x21c   :  { %p241_p7 = scmp.ne.s32.totalorder %s333_s4, %s240_s19  ;;  %p244_p8 = scmp.lt.u32.totalorder %s240_s19, %s333_s4 }
 0x21e   :  { %p246_p9 = pnand %p244_p8, %p241_p7 }
 0x220   :  { %249 = shalt.err (!%p246_p9)
}
 0x221   :  { %161 = dma.vmem_to_hbm [thread:$0]  %s159_s16, 32, %s333_s4, [#allocation5]  }
 0x222   :  { %254 = dma.done.wait [#allocation5], 32  }
 0x223   :  { %255 = vsyncadd [#allocation5], 4294967264 }
 0x224   :  { %165 = vsyncpa [#allocation4], 1 }
 0x225   :  { %166 = vsyncpa [#allocation7], 1 }
 0x226   :  { %167 = vsyncpa [#allocation5], 1 }

</bundles_post_ra>
